<compile_context>
chip_gen: v7x
topology: tpu7x:2x2x1
jax: 0.10.0
libtpu: 0.0.40
codegen_flags: <defaults>
</compile_context>

<pallas_src>
import functools
import math

import jax
import jax.numpy as jnp
from jax import lax
from jax.experimental import pallas as pl
from jax.experimental.pallas import tpu as pltpu

_INV_SQRT2 = 1.0 / math.sqrt(2.0)
_NEG_INF = -1e30
_VMEM_LIMIT = 32 * 1024 * 1024  # raises v5e's 16 MiB scoped default; == default on v6e/v7x


# ----------------------------------------------------------------------------
# small helpers
# ----------------------------------------------------------------------------
def _pad_to(x, mult, axis):
    s = x.shape[axis]
    pad = (-s) % mult
    if pad == 0:
        return x
    cfg = [(0, 0)] * x.ndim
    cfg[axis] = (0, pad)
    return jnp.pad(x, cfg)


def _choose_tile(n, cap, mult=8):
    """Largest tile <= cap that divides n (multiple of `mult`); n itself if n <= cap."""
    if n <= cap:
        return n
    best = None
    d = mult
    while d <= cap:
        if n % d == 0:
            best = d
        d += mult
    return best if best is not None else cap


# ----------------------------------------------------------------------------
# tiled matmul (+ bias, + optional fused residual)
# ----------------------------------------------------------------------------
def _matmul_kernel(a_ref, b_ref, bias_ref, *rest, fuse_res):
    if fuse_res:
        res_ref, o_ref, acc_ref = rest
    else:
        o_ref, acc_ref = rest
    k = pl.program_id(2)

    @pl.when(k == 0)
    def _():
        acc_ref[...] = jnp.zeros_like(acc_ref)

    # a/b pre-cast to bf16 in the wrapper -> no per-step VPU cast, halved A-tile DMA
    acc_ref[...] += jnp.dot(a_ref[...], b_ref[...],
                            preferred_element_type=jnp.float32)

    @pl.when(k == pl.num_programs(2) - 1)
    def _():
        r = acc_ref[...] + bias_ref[...]
        if fuse_res:
            r = r + res_ref[...].astype(jnp.float32)
        o_ref[...] = r.astype(o_ref.dtype)


def matmul_bias(a, b, bias=None, residual=None, out_dtype=jnp.bfloat16):
    """out = a @ b + bias (+ residual); bf16 MXU operands + streaming, f32 accumulation."""
    M, K = a.shape
    K2, N = b.shape
    assert K == K2
    if bias is None:
        bias = jnp.zeros((N,), jnp.float32)
    tm = _choose_tile(M, 1024)
    tk = K if K <= 1024 else 512
    tn = N if N <= 512 else (256 if N % 256 == 0 else 128)
    # TODO(synk): N=64 output tiles are lane-sparse (masked vst); a packed [M*C/128,128] out view
    # would be lane-dense but needs a relayout inside the kernel -- left as-is.

    ap = _pad_to(_pad_to(a.astype(jnp.bfloat16), tm, 0), tk, 1)
    bp = _pad_to(_pad_to(b.astype(jnp.bfloat16), tk, 0), tn, 1)
    biasp = _pad_to(bias.astype(jnp.float32).reshape(1, N), tn, 1)
    Mp, Kp = ap.shape
    Np = bp.shape[1]

    inputs = [ap, bp, biasp]
    in_specs = [pl.BlockSpec((tm, tk), lambda i, j, k: (i, k)),
                pl.BlockSpec((tk, tn), lambda i, j, k: (k, j)),
                pl.BlockSpec((1, tn), lambda i, j, k: (0, j))]
    fuse_res = residual is not None
    if fuse_res:
        rp = _pad_to(_pad_to(residual, tm, 0), tn, 1)
        inputs.append(rp)
        in_specs.append(pl.BlockSpec((tm, tn), lambda i, j, k: (i, j)))

    out = pl.pallas_call(
        functools.partial(_matmul_kernel, fuse_res=fuse_res),
        out_shape=jax.ShapeDtypeStruct((Mp, Np), out_dtype),
        grid_spec=pltpu.PrefetchScalarGridSpec(
            num_scalar_prefetch=0,
            grid=(Mp // tm, Np // tn, Kp // tk),
            in_specs=in_specs,
            out_specs=pl.BlockSpec((tm, tn), lambda i, j, k: (i, j)),
            scratch_shapes=[pltpu.VMEM((tm, tn), jnp.float32)]),
        compiler_params=pltpu.CompilerParams(
            dimension_semantics=("parallel", "parallel", "arbitrary"),
            vmem_limit_bytes=_VMEM_LIMIT),
    )(*inputs)
    if Mp != M or Np != N:
        out = out[:M, :N]
    return out


# ----------------------------------------------------------------------------
# fused GeGLU matmul: (a@wx + bx) * gelu(a@wg + bg)
# ----------------------------------------------------------------------------
def _matmul_geglu_kernel(a_ref, wx_ref, wg_ref, bx_ref, bg_ref, o_ref, accx, accg):
    k = pl.program_id(2)

    @pl.when(k == 0)
    def _():
        accx[...] = jnp.zeros_like(accx)
        accg[...] = jnp.zeros_like(accg)

    a = a_ref[...]
    accx[...] += jnp.dot(a, wx_ref[...], preferred_element_type=jnp.float32)
    accg[...] += jnp.dot(a, wg_ref[...], preferred_element_type=jnp.float32)

    @pl.when(k == pl.num_programs(2) - 1)
    def _():
        xh = accx[...] + bx_ref[...]
        g = accg[...] + bg_ref[...]
        o_ref[...] = (xh * (0.5 * g * (1.0 + lax.erf(g * _INV_SQRT2)))).astype(o_ref.dtype)


def matmul_geglu(a, wx, wg, bx, bg, out_dtype=jnp.bfloat16):
    M, K = a.shape
    N = wx.shape[1]
    tm = _choose_tile(M, 1024)
    tk = K if K <= 1024 else 512
    tn = N if N <= 512 else (256 if N % 256 == 0 else 128)
    ap = _pad_to(_pad_to(a.astype(jnp.bfloat16), tm, 0), tk, 1)
    wxp = _pad_to(_pad_to(wx.astype(jnp.bfloat16), tk, 0), tn, 1)
    wgp = _pad_to(_pad_to(wg.astype(jnp.bfloat16), tk, 0), tn, 1)
    bxp = _pad_to(bx.astype(jnp.float32).reshape(1, N), tn, 1)
    bgp = _pad_to(bg.astype(jnp.float32).reshape(1, N), tn, 1)
    Mp, Kp = ap.shape
    Np = wxp.shape[1]
    out = pl.pallas_call(
        _matmul_geglu_kernel,
        out_shape=jax.ShapeDtypeStruct((Mp, Np), out_dtype),
        grid_spec=pltpu.PrefetchScalarGridSpec(
            num_scalar_prefetch=0,
            grid=(Mp // tm, Np // tn, Kp // tk),
            in_specs=[pl.BlockSpec((tm, tk), lambda i, j, k: (i, k)),
                      pl.BlockSpec((tk, tn), lambda i, j, k: (k, j)),
                      pl.BlockSpec((tk, tn), lambda i, j, k: (k, j)),
                      pl.BlockSpec((1, tn), lambda i, j, k: (0, j)),
                      pl.BlockSpec((1, tn), lambda i, j, k: (0, j))],
            out_specs=pl.BlockSpec((tm, tn), lambda i, j, k: (i, j)),
            scratch_shapes=[pltpu.VMEM((tm, tn), jnp.float32),
                            pltpu.VMEM((tm, tn), jnp.float32)]),
        compiler_params=pltpu.CompilerParams(
            dimension_semantics=("parallel", "parallel", "arbitrary"),
            vmem_limit_bytes=_VMEM_LIMIT),
    )(ap, wxp, wgp, bxp, bgp)
    if Mp != M or Np != N:
        out = out[:M, :N]
    return out


# ----------------------------------------------------------------------------
# native 3x3 conv kernel (halo-band manual DMA, double buffered)
#   epilogue fuses bias + optional residual add and crops the 2 pad columns,
#   writing the output directly in token layout [B, HW, Cout] (bf16 by default).
# ----------------------------------------------------------------------------
def _choose_tile_h(h, w, cap=3200):
    wp = w + 2
    if h * wp <= cap:
        return h
    best = None
    for d in range(1, h + 1):
        if h % d == 0 and (d * wp) % 8 == 0 and d * wp <= cap:
            best = d
    return best if best is not None else h


def _conv3x3_kernel(x_hbm, w_ref, bias_ref, *rest, tile_h, out_w, wp,
                    band_alloc, rows_out, nhh, fuse_res):
    if fuse_res:
        res_ref, o_ref, xbuf, sem, acc_ref = rest
    else:
        o_ref, xbuf, sem, acc_ref = rest
    bi = pl.program_id(0)
    sp = pl.program_id(1)       # image-half split (parallel axis -> v7x 2nd TensorCore)
    hb = pl.program_id(2)       # band within the half (arbitrary: DMA prefetch chain)
    g = sp * nhh + hb           # global band index

    def band_copy(batch, block, slot):
        return pltpu.make_async_copy(
            x_hbm.at[batch, pl.ds(block * tile_h * wp, band_alloc)],
            xbuf.at[slot],
            sem.at[slot])

    @pl.when(hb == 0)
    def _():
        band_copy(bi, g, 0).start()

    slot = hb % 2
    band_copy(bi, g, slot).wait()

    @pl.when(hb + 1 < nhh)
    def _():
        band_copy(bi, g + 1, 1 - slot).start()

    acc_ref[...] = jnp.zeros_like(acc_ref)
    for dy in range(3):
        for dx in range(3):
            acc_ref[...] += jnp.dot(xbuf[slot, pl.ds(dy * wp + dx, rows_out), :],
                                    w_ref[dy * 3 + dx],
                                    preferred_element_type=jnp.float32)

    bias = bias_ref[...]
    # epilogue: bias (+ fused residual) add and VMEM-side crop of the 2 pad columns per row
    for rr in range(tile_h):
        val = acc_ref[pl.ds(rr * wp, out_w), :] + bias
        if fuse_res:
            val = val + res_ref[0, pl.ds(rr * out_w, out_w), :].astype(jnp.float32)
        o_ref[0, pl.ds(rr * out_w, out_w), :] = val.astype(o_ref.dtype)


def _conv3x3_pallas(x_tok, h, w, weight9, bias, residual=None,
                    out_dtype=jnp.bfloat16, tile_h=None):
    """x_tok: [B, HW, Cin]; weight9: [9, Cin, Cout]; 3x3, stride 1, pad 1."""
    B, HW, Cin = x_tok.shape
    Cout = weight9.shape[-1]
    wp = w + 2
    if tile_h is None:
        tile_h = _choose_tile_h(h, w)
    nh = h // tile_h
    n_split = 2 if (nh % 2 == 0 and nh >= 2) else 1   # expose a >=2 parallel axis when possible
    nhh = nh // n_split
    rows_out = tile_h * wp
    band_alloc = (tile_h + 2) * wp + 8   # +8 zero rows so column-pad positions never read OOB

    # TODO(synk): the spatial pad (and the 2x upsample before the Upsample conv) are still
    # materialized in HBM by XLA; fusing them into the band DMA would remove that traffic.
    x = x_tok.reshape(B, h, w, Cin).astype(jnp.bfloat16)
    xp = jnp.pad(x, ((0, 0), (1, 1), (1, 1), (0, 0)))
    xflat = jnp.pad(xp.reshape(B, (h + 2) * wp, Cin), ((0, 0), (0, 8), (0, 0)))

    fuse_res = residual is not None
    inputs = [xflat, weight9.astype(jnp.bfloat16),
              bias.astype(jnp.float32).reshape(1, Cout)]
    in_specs = [pl.BlockSpec(memory_space=pl.ANY),
                pl.BlockSpec((9, Cin, Cout), lambda b, s, hb: (0, 0, 0)),
                pl.BlockSpec((1, Cout), lambda b, s, hb: (0, 0))]
    if fuse_res:
        inputs.append(residual.reshape(B, HW, Cout))
        in_specs.append(pl.BlockSpec((1, tile_h * w, Cout),
                                     lambda b, s, hb, n=nhh: (b, s * n + hb, 0)))

    kern = functools.partial(_conv3x3_kernel, tile_h=tile_h, out_w=w, wp=wp,
                             band_alloc=band_alloc, rows_out=rows_out,
                             nhh=nhh, fuse_res=fuse_res)
    out = pl.pallas_call(
        kern,
        out_shape=jax.ShapeDtypeStruct((B, HW, Cout), out_dtype),
        grid_spec=pltpu.PrefetchScalarGridSpec(
            num_scalar_prefetch=0,
            grid=(B, n_split, nhh),
            in_specs=in_specs,
            out_specs=pl.BlockSpec((1, tile_h * w, Cout),
                                   lambda b, s, hb, n=nhh: (b, s * n + hb, 0)),
            scratch_shapes=[pltpu.VMEM((2, band_alloc, Cin), jnp.bfloat16),
                            pltpu.SemaphoreType.DMA((2,)),
                            pltpu.VMEM((rows_out, Cout), jnp.float32)]),
        compiler_params=pltpu.CompilerParams(
            dimension_semantics=("parallel", "parallel", "arbitrary"),
            vmem_limit_bytes=_VMEM_LIMIT),
    )(*inputs)
    return out


def _conv3x3_im2col(x_tok, h, w, weight9, bias, residual=None, out_dtype=jnp.bfloat16):
    B, HW, Cin = x_tok.shape
    Cout = weight9.shape[-1]
    x = x_tok.reshape(B, h, w, Cin)
    xp = jnp.pad(x, ((0, 0), (1, 1), (1, 1), (0, 0)))
    patches = [xp[:, dy:dy + h, dx:dx + w, :] for dy in range(3) for dx in range(3)]
    patches = jnp.concatenate(patches, axis=-1).reshape(B * HW, 9 * Cin)
    res2d = residual.reshape(B * HW, Cout) if residual is not None else None
    out = matmul_bias(patches, weight9.reshape(9 * Cin, Cout), bias,
                      residual=res2d, out_dtype=out_dtype)
    return out.reshape(B, HW, Cout)


_CONV_OK = None


def _conv_pallas_ok():
    global _CONV_OK
    if _CONV_OK is None:
        try:
            h, w, cin, cout = 32, 8, 64, 64
            kx, kw, kr = jax.random.split(jax.random.PRNGKey(123), 3)
            x = jax.random.normal(kx, (1, h * w, cin), jnp.float32)
            w9 = (jax.random.normal(kw, (9, cin, cout), jnp.float32)
                  / math.sqrt(9 * cin)).astype(jnp.bfloat16)
            b = jnp.zeros((cout,), jnp.float32)
            res = jax.random.normal(kr, (1, h * w, cout), jnp.float32).astype(jnp.bfloat16)
            # tile_h=8 -> nh=4 -> split grid (2 halves x 2 bands): exercises the prefetch chain,
            # the fused residual and the in-kernel crop.
            got = _conv3x3_pallas(x, h, w, w9, b, residual=res, tile_h=8)
            xq = x.astype(jnp.bfloat16).astype(jnp.float32).reshape(1, h, w, cin)
            xpad = jnp.pad(xq, ((0, 0), (1, 1), (1, 1), (0, 0)))
            pat = jnp.concatenate([xpad[:, dy:dy + h, dx:dx + w, :]
                                   for dy in range(3) for dx in range(3)], -1)
            ref = (pat.reshape(h * w, 9 * cin)
                   @ w9.astype(jnp.float32).reshape(9 * cin, cout)
                   + res[0].astype(jnp.float32))
            _CONV_OK = bool(jnp.allclose(got[0].astype(jnp.float32), ref,
                                         rtol=1e-1, atol=1e-1))
        except Exception:
            _CONV_OK = False
    return _CONV_OK


def conv3x3(x_tok, h, w, weight9, bias, residual=None, out_dtype=jnp.bfloat16):
    if _conv_pallas_ok():
        return _conv3x3_pallas(x_tok, h, w, weight9, bias,
                               residual=residual, out_dtype=out_dtype)
    # TODO(synk): halo-DMA conv failed probe on this build -> im2col fallback (9x HBM blowup).
    return _conv3x3_im2col(x_tok, h, w, weight9, bias,
                           residual=residual, out_dtype=out_dtype)


# ----------------------------------------------------------------------------
# GroupNorm: stats-reduction + normalize(+SiLU), lane-dense packed when C < 128
# ----------------------------------------------------------------------------
def _gn_stats_kernel(x_ref, s_ref):
    t = pl.program_id(1)

    @pl.when(t == 0)
    def _():
        s_ref[...] = jnp.zeros_like(s_ref)

    x = x_ref[0].astype(jnp.float32)
    s_ref[0, 0:1, :] += jnp.sum(x, axis=0, keepdims=True)
    s_ref[0, 1:2, :] += jnp.sum(x * x, axis=0, keepdims=True)


def _gn_norm_kernel(x_ref, scale_ref, shift_ref, o_ref, *, apply_silu):
    x = x_ref[0].astype(jnp.float32)
    y = x * scale_ref[0] + shift_ref[0]
    if apply_silu:
        y = y * jax.nn.sigmoid(y)
    o_ref[0] = y.astype(o_ref.dtype)


def _choose_ts(T, C):
    cap = max(8, (512 * 1024) // max(C, 1))   # keep each block <= ~2MB f32 (v7x-safe)
    if T <= cap:
        return T
    best = None
    d = 8
    while d <= cap:
        if T % d == 0:
            best = d
        d += 8
    return best if best is not None else T


def group_norm(x, gamma, beta, num_groups, eps, apply_silu=False, out_dtype=jnp.bfloat16):
    """x: [B, HW, C]. NOTE: one-pass E[x^2]-E[x]^2 variance (clamped at 0), stats in f32."""
    B, HW, C = x.shape
    if C < 128 and 128 % C == 0 and (HW * C) % 128 == 0:
        rep = 128 // C
        C2, T2 = 128, (HW * C) // 128
    else:
        rep, C2, T2 = 1, C, HW
    x2 = x.reshape(B, T2, C2)
    TS = _choose_ts(T2, C2)
    if T2 % TS:
        TS = T2
    nt = T2 // TS

    stats = pl.pallas_call(
        _gn_stats_kernel,
        out_shape=jax.ShapeDtypeStruct((B, 2, C2), jnp.float32),
        grid=(B, nt),
        in_specs=[pl.BlockSpec((1, TS, C2), lambda b, t: (b, t, 0))],
        out_specs=pl.BlockSpec((1, 2, C2), lambda b, t: (b, 0, 0)),
        compiler_params=pltpu.CompilerParams(
            dimension_semantics=("parallel", "arbitrary")),
    )(x2)

    s, ss = stats[:, 0, :], stats[:, 1, :]
    if rep > 1:
        s = s.reshape(B, rep, C).sum(axis=1)
        ss = ss.reshape(B, rep, C).sum(axis=1)

    cs = C // num_groups
    sg = s.reshape(B, num_groups, cs)
    ssg = ss.reshape(B, num_groups, cs)
    cnt = float(HW * cs)
    mean = jnp.sum(sg, axis=-1, keepdims=True) / cnt
    var = jnp.maximum(jnp.sum(ssg, axis=-1, keepdims=True) / cnt - mean * mean, 0.0)
    inv = 1.0 / jnp.sqrt(var + eps)
    mean_c = jnp.broadcast_to(mean, (B, num_groups, cs)).reshape(B, 1, C)
    inv_c = jnp.broadcast_to(inv, (B, num_groups, cs)).reshape(B, 1, C)
    scale = inv_c * gamma.reshape(1, 1, C)
    shift = beta.reshape(1, 1, C) - mean_c * scale
    if rep > 1:
        scale = jnp.tile(scale, (1, 1, rep))
        shift = jnp.tile(shift, (1, 1, rep))

    out = pl.pallas_call(
        functools.partial(_gn_norm_kernel, apply_silu=apply_silu),
        out_shape=jax.ShapeDtypeStruct((B, T2, C2), out_dtype),
        grid=(B, nt),
        in_specs=[pl.BlockSpec((1, TS, C2), lambda b, t: (b, t, 0)),
                  pl.BlockSpec((1, 1, C2), lambda b, t: (b, 0, 0)),
                  pl.BlockSpec((1, 1, C2), lambda b, t: (b, 0, 0))],
        out_specs=pl.BlockSpec((1, TS, C2), lambda b, t: (b, t, 0)),
        compiler_params=pltpu.CompilerParams(
            dimension_semantics=("parallel", "parallel")),
    )(x2, scale, shift)
    return out.reshape(B, HW, C)


# ----------------------------------------------------------------------------
# LayerNorm kernel
# ----------------------------------------------------------------------------
def _layernorm_kernel(x_ref, g_ref, b_ref, o_ref, *, eps):
    x = x_ref[...].astype(jnp.float32)
    mean = jnp.mean(x, axis=-1, keepdims=True)
    var = jnp.maximum(jnp.mean(x * x, axis=-1, keepdims=True) - mean * mean, 0.0)
    inv = lax.rsqrt(var + eps)
    o_ref[...] = ((x - mean) * inv * g_ref[...] + b_ref[...]).astype(o_ref.dtype)


def layer_norm(x2d, gamma, beta, eps=1e-5, out_dtype=jnp.bfloat16):
    M, C = x2d.shape
    tm = _choose_tile(M, 1024)
    xp = _pad_to(x2d, tm, 0)
    Mp = xp.shape[0]
    out = pl.pallas_call(
        functools.partial(_layernorm_kernel, eps=eps),
        out_shape=jax.ShapeDtypeStruct((Mp, C), out_dtype),
        grid=(Mp // tm,),
        in_specs=[pl.BlockSpec((tm, C), lambda i: (i, 0)),
                  pl.BlockSpec((1, C), lambda i: (0, 0)),
                  pl.BlockSpec((1, C), lambda i: (0, 0))],
        out_specs=pl.BlockSpec((tm, C), lambda i: (i, 0)),
        compiler_params=pltpu.CompilerParams(dimension_semantics=("parallel",)),
    )(xp, gamma.reshape(1, C), beta.reshape(1, C))
    return out[:M] if Mp != M else out


_ERF_OK = None


def _erf_ok():
    global _ERF_OK
    if _ERF_OK is None:
        def _k(x_ref, o_ref):
            o_ref[...] = lax.erf(x_ref[...])
        try:
            x = jnp.zeros((8, 128), jnp.float32)
            jax.block_until_ready(
                pl.pallas_call(_k, out_shape=jax.ShapeDtypeStruct((8, 128), jnp.float32))(x))
            _ERF_OK = True
        except Exception:
            _ERF_OK = False
    return _ERF_OK


# ----------------------------------------------------------------------------
# flash-style attention kernel (online softmax)
#   - softmax scale folded onto the q tile (bq x D instead of bq x bk multiplies)
#   - kv mask only generated when the kv length was actually padded (static flag)
#   - exp on a bf16 score path (m/acc stay f32)
#   - softmax denominator obtained from the PV matmul via a ones-column in V
# ----------------------------------------------------------------------------
def _attn_kernel(q_ref, k_ref, v_ref, o_ref, m_sc, acc_sc, *,
                 scale, need_mask, kv_len, block_k, d_head):
    ki = pl.program_id(2)

    @pl.when(ki == 0)
    def _():
        m_sc[...] = jnp.full_like(m_sc, _NEG_INF)
        acc_sc[...] = jnp.zeros_like(acc_sc)

    q = (q_ref[0] * scale).astype(jnp.bfloat16)
    s = lax.dot_general(q, k_ref[0], (((1,), (1,)), ((), ())),
                        preferred_element_type=jnp.float32)
    if need_mask:
        kv_idx = ki * block_k + lax.broadcasted_iota(jnp.int32, s.shape, 1)
        s = jnp.where(kv_idx < kv_len, s, _NEG_INF)

    m_prev = m_sc[...]
    m_new = jnp.maximum(m_prev, jnp.max(s, axis=-1, keepdims=True))
    alpha = jnp.exp(m_prev - m_new)
    p = jnp.exp((s - m_new).astype(jnp.bfloat16))          # bf16 EUP path (v6e/v7x)
    acc_sc[...] = alpha * acc_sc[...] + jnp.dot(p, v_ref[0],
                                                preferred_element_type=jnp.float32)
    m_sc[...] = m_new

    @pl.when(ki == pl.num_programs(2) - 1)
    def _():
        acc = acc_sc[...]
        o_ref[0] = (acc[:, :d_head]
                    * pl.reciprocal(acc[:, d_head:], approx=True)).astype(o_ref.dtype)


def attention(q, k, v):
    """softmax(q k^T / sqrt(D)) v ; q:[BH,Sq,D], k,v:[BH,Sk,D]."""
    BH, Sq, D = q.shape
    Sk = k.shape[1]
    scale = 1.0 / math.sqrt(D)
    block_q = _choose_tile(Sq, 1568 if D <= 64 else 512)   # fewer K/V re-streams for small dh
    block_k = _choose_tile(Sk, 512)
    # ones column appended to V -> softmax denominator comes out of the PV matmul
    v_aug = jnp.concatenate([v, jnp.ones((BH, Sk, 1), v.dtype)], axis=-1)
    qp = _pad_to(q, block_q, 1)
    kp = _pad_to(k, block_k, 1)
    vp = _pad_to(v_aug, block_k, 1)
    Sqp, Skp = qp.shape[1], kp.shape[1]
    need_mask = Skp != Sk
    kern = functools.partial(_attn_kernel, scale=scale, need_mask=need_mask,
                             kv_len=Sk, block_k=block_k, d_head=D)
    out = pl.pallas_call(
        kern,
        out_shape=jax.ShapeDtypeStruct((BH, Sqp, D), q.dtype),
        grid_spec=pltpu.PrefetchScalarGridSpec(
            num_scalar_prefetch=0,
            grid=(BH, Sqp // block_q, Skp // block_k),
            in_specs=[pl.BlockSpec((1, block_q, D), lambda b, qi, ki: (b, qi, 0)),
                      pl.BlockSpec((1, block_k, D), lambda b, qi, ki: (b, ki, 0)),
                      pl.BlockSpec((1, block_k, D + 1), lambda b, qi, ki: (b, ki, 0))],
            out_specs=pl.BlockSpec((1, block_q, D), lambda b, qi, ki: (b, qi, 0)),
            scratch_shapes=[pltpu.VMEM((block_q, 1), jnp.float32),
                            pltpu.VMEM((block_q, D + 1), jnp.float32)]),
        compiler_params=pltpu.CompilerParams(
            dimension_semantics=("parallel", "parallel", "arbitrary"),
            vmem_limit_bytes=_VMEM_LIMIT),
    )(qp, kp, vp)
    if Sqp != Sq:
        out = out[:, :Sq, :]
    return out


# ----------------------------------------------------------------------------
# model blocks
# ----------------------------------------------------------------------------
def self_attention(x, p, n_head, residual):
    B, S, C = x.shape
    dh = C // n_head
    qkv = matmul_bias(x.reshape(B * S, C), p['in_proj_w'])
    qkv = qkv.reshape(B, S, 3, n_head, dh)

    def heads(t):
        return t.transpose(0, 2, 1, 3).reshape(B * n_head, S, dh)

    q, k, v = heads(qkv[:, :, 0]), heads(qkv[:, :, 1]), heads(qkv[:, :, 2])
    o = attention(q, k, v)
    o = o.reshape(B, n_head, S, dh).transpose(0, 2, 1, 3).reshape(B * S, C)
    return matmul_bias(o, p['out_proj_w'], p['out_proj_b'], residual=residual)


def cross_attention(x, ctx, p, n_head, residual):
    B, S, C = x.shape
    _, Sc, Dc = ctx.shape
    dh = C // n_head
    q = matmul_bias(x.reshape(B * S, C), p['q_w'])
    k = matmul_bias(ctx.reshape(B * Sc, Dc), p['k_w'])
    v = matmul_bias(ctx.reshape(B * Sc, Dc), p['v_w'])
    q = q.reshape(B, S, n_head, dh).transpose(0, 2, 1, 3).reshape(B * n_head, S, dh)
    k = k.reshape(B, Sc, n_head, dh).transpose(0, 2, 1, 3).reshape(B * n_head, Sc, dh)
    v = v.reshape(B, Sc, n_head, dh).transpose(0, 2, 1, 3).reshape(B * n_head, Sc, dh)
    o = attention(q, k, v)
    o = o.reshape(B, n_head, S, dh).transpose(0, 2, 1, 3).reshape(B * S, C)
    return matmul_bias(o, p['out_w'], p['out_b'], residual=residual)


def geglu_ffn(x2d, p):
    if _erf_ok():
        return matmul_geglu(x2d, p['geglu1_wx'], p['geglu1_wg'],
                            p['geglu1_bx'], p['geglu1_bg'])
    # TODO(synk): lax.erf not lowerable in this Mosaic build -> exact gelu in XLA glue.
    xh = matmul_bias(x2d, p['geglu1_wx'], p['geglu1_bx'], out_dtype=jnp.float32)
    gh = matmul_bias(x2d, p['geglu1_wg'], p['geglu1_bg'], out_dtype=jnp.float32)
    return (xh * (0.5 * gh * (1.0 + lax.erf(gh * _INV_SQRT2)))).astype(jnp.bfloat16)


def attention_block(x_tok, ctx, p, n_head):
    B, HW, C = x_tok.shape
    residue_long = x_tok.reshape(B * HW, C)
    x = group_norm(x_tok, p['gn_g'], p['gn_b'], 32, 1e-6)
    x = matmul_bias(x.reshape(B * HW, C), p['conv_in_w'], p['conv_in_b'])

    residue = x
    xl = layer_norm(x, p['ln1_g'], p['ln1_b'])
    x = self_attention(xl.reshape(B, HW, C), p['attn1'], n_head, residual=residue)

    residue = x
    xl = layer_norm(x, p['ln2_g'], p['ln2_b'])
    x = cross_attention(xl.reshape(B, HW, C), ctx, p['attn2'], n_head, residual=residue)

    residue = x
    xl = layer_norm(x, p['ln3_g'], p['ln3_b'])
    g = geglu_ffn(xl, p)
    x = matmul_bias(g, p['geglu2_w'], p['geglu2_b'], residual=residue)

    x = matmul_bias(x, p['conv_out_w'], p['conv_out_b'], residual=residue_long)
    return x.reshape(B, HW, C)


def residual_block(x_tok, h, w, p):
    B, HW, Cin = x_tok.shape
    if 'res_w' in p:
        Cout = p['res_w'].shape[1]
        residue = matmul_bias(x_tok.reshape(B * HW, Cin), p['res_w'], p['res_b'])
    else:
        Cout = Cin
        residue = x_tok.reshape(B * HW, Cin)
    residue = residue.reshape(B, HW, Cout)
    f = group_norm(x_tok, p['gn1_g'], p['gn1_b'], 32, 1e-5, apply_silu=True)
    merged = conv3x3(f, h, w, p['conv1_w'], p['conv1_b'], residual=residue)
    m = group_norm(merged, p['gn2_g'], p['gn2_b'], 32, 1e-5, apply_silu=True)
    out = conv3x3(m, h, w, p['conv2_w'], p['conv2_b'], residual=residue)
    return out


def upsample_block(x_tok, h, w, p):
    B, HW, C = x_tok.shape
    x = x_tok.astype(jnp.bfloat16).reshape(B, h, w, C)
    x = jnp.repeat(jnp.repeat(x, 2, axis=1), 2, axis=2)          # nearest 2x
    h2, w2 = 2 * h, 2 * w
    x = x.reshape(B, h2 * w2, C)
    return conv3x3(x, h2, w2, p['conv_w'], p['conv_b']), h2, w2


def unet_forward(x_tok, h, w, ctx, p):
    x = attention_block(x_tok, ctx, p['bottleneck_attn'], n_head=2)
    x = residual_block(x, h, w, p['bottleneck_res'])
    for dec in p['decoders']:
        x = residual_block(x, h, w, dec['res'])
        x = attention_block(x, ctx, dec['attn'], n_head=dec['n_head'])
        x, h, w = upsample_block(x, h, w, dec['up'])
        # nn.Dropout(0.2): inference/eval mode -> identity
    return x, h, w


def output_layer(x_tok, h, w, p):
    x = group_norm(x_tok, p['gn_g'], p['gn_b'], 2, 1e-5, apply_silu=True)
    return conv3x3(x, h, w, p['conv_w'], p['conv_b'], out_dtype=jnp.float32)


def diffusion_forward(latent, context, params):
    del latent  # Diffusion.forward overwrites `latent` with linear_layer_img(context)
    B = context.shape[0]
    ctx_b = context.astype(jnp.bfloat16)
    # M=1 weight-streaming projections: plain jnp.dot (bf16 weights) beats a padded Pallas matmul
    lat = (jnp.dot(ctx_b, params['lin_img_w'], preferred_element_type=jnp.float32)
           + params['lin_img_b'])                                             # [B, 3136]
    lat = lat.reshape(B, 64, 7, 7).transpose(0, 2, 3, 1).reshape(B, 49, 64)   # NCHW view -> tokens
    ctx = (jnp.dot(ctx_b, params['lin_ctx_w'], preferred_element_type=jnp.float32)
           + params['lin_ctx_b']).reshape(B, 77, 256)
    x, h, w = unet_forward(lat, 7, 7, ctx, params['unet'])
    out = output_layer(x, h, w, params['final'])                              # [B, HW, 3] f32
    return out.reshape(B, h, w, 3).transpose(0, 3, 1, 2)                      # NCHW [B,3,224,224]


# ----------------------------------------------------------------------------
# deterministic parameter init (synthetic; weights stored bf16, biases/norms f32)
# ----------------------------------------------------------------------------
class _KeyGen:
    def __init__(self, seed):
        self._key = jax.random.PRNGKey(seed)

    def __call__(self):
        self._key, sub = jax.random.split(self._key)
        return sub


def init_params(seed=42):
    kg = _KeyGen(seed)

    def dense(fan_in, fan_out):
        return (jax.random.normal(kg(), (fan_in, fan_out), jnp.float32)
                / math.sqrt(fan_in)).astype(jnp.bfloat16)

    def conv3(cin, cout):
        return (jax.random.normal(kg(), (9, cin, cout), jnp.float32)
                / math.sqrt(9 * cin)).astype(jnp.bfloat16)

    def zeros(n):
        return jnp.zeros((n,), jnp.float32)

    def ones(n):
        return jnp.ones((n,), jnp.float32)

    def attn_block(n_head, n_embd, d_ctx=256):
        C = n_head * n_embd
        return dict(
            gn_g=ones(C), gn_b=zeros(C),
            conv_in_w=dense(C, C), conv_in_b=zeros(C),
            ln1_g=ones(C), ln1_b=zeros(C),
            attn1=dict(in_proj_w=dense(C, 3 * C),
                       out_proj_w=dense(C, C), out_proj_b=zeros(C)),
            ln2_g=ones(C), ln2_b=zeros(C),
            attn2=dict(q_w=dense(C, C), k_w=dense(d_ctx, C), v_w=dense(d_ctx, C),
                       out_w=dense(C, C), out_b=zeros(C)),
            ln3_g=ones(C), ln3_b=zeros(C),
            geglu1_wx=dense(C, 4 * C), geglu1_bx=zeros(4 * C),
            geglu1_wg=dense(C, 4 * C), geglu1_bg=zeros(4 * C),
            geglu2_w=dense(4 * C, C), geglu2_b=zeros(C),
            conv_out_w=dense(C, C), conv_out_b=zeros(C),
        )

    def res_block(cin, cout):
        p = dict(
            gn1_g=ones(cin), gn1_b=zeros(cin),
            conv1_w=conv3(cin, cout), conv1_b=zeros(cout),
            gn2_g=ones(cout), gn2_b=zeros(cout),
            conv2_w=conv3(cout, cout), conv2_b=zeros(cout),
        )
        if cin != cout:
            p['res_w'] = dense(cin, cout)
            p['res_b'] = zeros(cout)
        return p

    def up_block(c):
        return dict(conv_w=conv3(c, c), conv_b=zeros(c))

    dec_cfg = [(128, 128, 4, 32), (128, 256, 4, 64), (256, 256, 4, 64),
               (256, 128, 4, 32), (128, 64, 4, 16)]
    return dict(
        lin_img_w=dense(512, 7 * 7 * 64), lin_img_b=zeros(7 * 7 * 64),
        lin_ctx_w=dense(512, 77 * 256), lin_ctx_b=zeros(77 * 256),
        unet=dict(
            bottleneck_attn=attn_block(2, 32),
            bottleneck_res=res_block(64, 128),
            decoders=[dict(res=res_block(ci, co), attn=attn_block(nh, ne),
                           up=up_block(co), n_head=nh)
                      for (ci, co, nh, ne) in dec_cfg],
        ),
        final=dict(gn_g=ones(64), gn_b=zeros(64),
                   conv_w=conv3(64, 3), conv_b=zeros(3)),
    )


# ----------------------------------------------------------------------------
# main
# ----------------------------------------------------------------------------
if __name__ == "__main__":
    B = 1
    k1, k2 = jax.random.split(jax.random.PRNGKey(0))
    # `latent` is ignored by Diffusion.forward (it is overwritten); kept for signature parity.
    latent = jax.random.normal(k1, (B, 64, 7, 7), jnp.float32)
    context = jax.random.normal(k2, (B, 512), jnp.float32)

    params = init_params(seed=42)
    out = diffusion_forward(latent, context, params)
    out = jax.block_until_ready(out)

    assert out.shape == (B, 3, 224, 224), out.shape
    assert bool(jnp.all(jnp.isfinite(out)))
    print("KERNEL_OK")
</pallas_src>

<mosaic_0001>
module attributes {stable_mosaic.version = 11 : i64} {
  func.func @_gn_stats_kernel(%arg0: i32, %arg1: i32, %arg2: memref<1x49x64xf32, #tpu.memory_space<vmem>>, %arg3: memref<1x2x64xf32, #tpu.memory_space<vmem>>) attributes {dimension_semantics = [#tpu.dimension_semantics<parallel>, #tpu.dimension_semantics<arbitrary>], iteration_bounds = array<i64: 1, 1>, scalar_prefetch = 0 : i64, scratch_operands = 0 : i64, tpu.core_type = #tpu.core_type<tc>, window_params = [{transform_indices = @transform_0, window_bounds = array<i64: 1, 49, 64>}, {transform_indices = @transform_1, window_bounds = array<i64: 1, 2, 64>}]} {
    %c0_i32 = arith.constant 0 : i32
    %0 = arith.cmpi eq, %arg1, %c0_i32 : i32
    %1 = arith.extui %0 : i1 to i32
    %c0_i32_0 = arith.constant 0 : i32
    %2 = arith.cmpi ne, %1, %c0_i32_0 : i32
    scf.if %2 {
      %cst_15 = arith.constant 0.000000e+00 : f32
      %22 = vector.broadcast %cst_15 : f32 to vector<1x2x64xf32>
      %c0_16 = arith.constant 0 : index
      %c0_17 = arith.constant 0 : index
      %c0_18 = arith.constant 0 : index
      %23 = vector.load %arg3[%c0_16, %c0_17, %c0_18] : memref<1x2x64xf32, #tpu.memory_space<vmem>>, vector<1x2x64xf32>
      tpu.vector_store %arg3[%c0_16, %c0_17, %c0_18], %22 {strides = array<i32>} : memref<1x2x64xf32, #tpu.memory_space<vmem>>, vector<1x2x64xf32>,
    } else {
    }
    %c0 = arith.constant 0 : index
    %c0_1 = arith.constant 0 : index
    %c0_2 = arith.constant 0 : index
    %3 = vector.load %arg2[%c0, %c0_1, %c0_2] : memref<1x49x64xf32, #tpu.memory_space<vmem>>, vector<1x49x64xf32>
    %4 = vector.shape_cast %3 : vector<1x49x64xf32> to vector<49x64xf32>
    %c0_3 = arith.constant 0 : index
    %c0_4 = arith.constant 0 : index
    %c0_5 = arith.constant 0 : index
    %5 = vector.load %arg3[%c0_3, %c0_4, %c0_5] : memref<1x2x64xf32, #tpu.memory_space<vmem>>, vector<1x1x64xf32>
    %6 = vector.shape_cast %5 : vector<1x1x64xf32> to vector<1x64xf32>
    %cst = arith.constant dense<0.000000e+00> : vector<64xf32>
    %7 = vector.multi_reduction <add>, %4, %cst [0] : vector<49x64xf32> to vector<64xf32>
    %8 = vector.shape_cast %7 : vector<64xf32> to vector<1x64xf32>
    %9 = arith.addf %6, %8 : vector<1x64xf32>
    %c0_6 = arith.constant 0 : index
    %c0_7 = arith.constant 0 : index
    %c0_8 = arith.constant 0 : index
    %10 = vector.load %arg3[%c0_6, %c0_7, %c0_8] : memref<1x2x64xf32, #tpu.memory_space<vmem>>, vector<1x1x64xf32>
    %11 = vector.shape_cast %10 : vector<1x1x64xf32> to vector<1x64xf32>
    %12 = vector.shape_cast %9 : vector<1x64xf32> to vector<1x1x64xf32>
    tpu.vector_store %arg3[%c0_6, %c0_7, %c0_8], %12 {strides = array<i32>} : memref<1x2x64xf32, #tpu.memory_space<vmem>>, vector<1x1x64xf32>,
    %c0_9 = arith.constant 0 : index
    %c1 = arith.constant 1 : index
    %c0_10 = arith.constant 0 : index
    %13 = vector.load %arg3[%c0_9, %c1, %c0_10] : memref<1x2x64xf32, #tpu.memory_space<vmem>>, vector<1x1x64xf32>
    %14 = vector.shape_cast %13 : vector<1x1x64xf32> to vector<1x64xf32>
    %15 = arith.mulf %4, %4 : vector<49x64xf32>
    %cst_11 = arith.constant dense<0.000000e+00> : vector<64xf32>
    %16 = vector.multi_reduction <add>, %15, %cst_11 [0] : vector<49x64xf32> to vector<64xf32>
    %17 = vector.shape_cast %16 : vector<64xf32> to vector<1x64xf32>
    %18 = arith.addf %14, %17 : vector<1x64xf32>
    %c0_12 = arith.constant 0 : index
    %c1_13 = arith.constant 1 : index
    %c0_14 = arith.constant 0 : index
    %19 = vector.load %arg3[%c0_12, %c1_13, %c0_14] : memref<1x2x64xf32, #tpu.memory_space<vmem>>, vector<1x1x64xf32>
    %20 = vector.shape_cast %19 : vector<1x1x64xf32> to vector<1x64xf32>
    %21 = vector.shape_cast %18 : vector<1x64xf32> to vector<1x1x64xf32>
    tpu.vector_store %arg3[%c0_12, %c1_13, %c0_14], %21 {strides = array<i32>} : memref<1x2x64xf32, #tpu.memory_space<vmem>>, vector<1x1x64xf32>,
    return
  }
  func.func @transform_0(%arg0: i32, %arg1: i32) -> (i32, i32, i32) {
    %c0_i32 = arith.constant 0 : i32
    %c0_i32_0 = arith.constant 0 : i32
    return %arg0, %arg1, %c0_i32 : i32, i32, i32
  }
  func.func @transform_1(%arg0: i32, %arg1: i32) -> (i32, i32, i32) {
    %c0_i32 = arith.constant 0 : i32
    %c0_i32_0 = arith.constant 0 : i32
    %c0_i32_1 = arith.constant 0 : i32
    return %arg0, %c0_i32, %c0_i32_0 : i32, i32, i32
  }
}

</mosaic_0001>

<bundles_post_ra>
// kernel: tpu_custom_call.1
= control target key start
LH: loop header
LB: loop body
LE: loop exit
PB: predicated region body
PF: predicated region fallthrough
CT: control target
= control target key end

     0   :  { %vm13_vm0 = vcmask 517120   ;;  %vm23_vm1 = vcmask 523264   ;;  %v115_v3 = vmov 0.0   ;;  %s176_s0 = inlined_call_operand.vmem [shape: f32[1,49,64], index: 0, kind: input, shape index: {}]   ;;  %s177_s1 = inlined_call_operand.hbm [shape: f32[1,2,64], index: 1, kind: output, shape index: {}]  }
   0x1   :  { %v15_v0 = vld [vmem:[%s176_s0] sm:$0xff]  ;;  %v16_v1 = vld [vmem:[%s176_s0 + $0x8] sm:$0xff]  ;;  %v17_v2 = vld [vmem:[%s176_s0 + $0x10] sm:$0xff]  ;;  %14 = vst.msk [vmem:[#allocation2] sm:$0x3] %vm13_vm0, %v115_v3 }
   0x2   :  { %v18_v4 = vld [vmem:[%s176_s0 + $0x18] sm:$0xff]  ;;  %v24_v5 = vsel %vm23_vm1, %v15_v0, 0.0  ;;  %v25_v6 = vsel %vm23_vm1, %v16_v1, 0.0  ;;  %v27_v7 = vsel %vm23_vm1, %v17_v2, 0.0  ;;  %v47_v8 = vmul.f32 %v15_v0, %v15_v0  ;;  %v19_v9 = vld [vmem:[%s176_s0 + $0x20] sm:$0xff] }
   0x3   :  { %v26_v10 = vadd.f32 %v25_v6, %v24_v5  ;;  %v29_v11 = vsel %vm23_vm1, %v18_v4, 0.0  ;;  %v48_v12 = vmul.f32 %v16_v1, %v16_v1  ;;  %v49_v13 = vmul.f32 %v17_v2, %v17_v2 }
   0x4   :  { %v50_v14 = vmul.f32 %v18_v4, %v18_v4 }
   0x5   :  { %6 = vsyncpa [#allocation3], 0  ;;  %v20_v15 = vld [vmem:[%s176_s0 + $0x28] sm:$0xff]  ;;  %v28_v16 = vadd.f32 %v27_v7, %v26_v10  ;;  %v31_v17 = vsel %vm23_vm1, %v19_v9, 0.0  ;;  %v51_v18 = vmul.f32 %v19_v9, %v19_v9  ;;  %v54_v19 = vsel %vm23_vm1, %v47_v8, 0.0 }
   0x6   :  { %v55_v20 = vsel %vm23_vm1, %v48_v12, 0.0  ;;  %v57_v21 = vsel %vm23_vm1, %v49_v13, 0.0  ;;  %v21_v22 = vld [vmem:[%s176_s0 + $0x30] sm:$0x1]  ;;  %vm35_vm2 = vcmask 516096   ;;  %v33_v25 = vsel %vm23_vm1, %v20_v15, 0.0 }
   0x7   :  { %v30_v23 = vadd.f32 %v29_v11, %v28_v16  ;;  %v56_v24 = vadd.f32 %v55_v20, %v54_v19  ;;  %v52_v26 = vmul.f32 %v20_v15, %v20_v15  ;;  %v59_v27 = vsel %vm23_vm1, %v50_v14, 0.0  ;;  %s116_s0 = smov [#allocation2]  }
   0x8   :  { %v36_v30 = vsel %vm35_vm2, %v21_v22, 0.0  ;;  %v53_v31 = vmul.f32 %v21_v22, %v21_v22  ;;  %v61_v32 = vsel %vm23_vm1, %v51_v18, 0.0  ;;  %v22_v49 = vld [vmem:[#allocation2] sm:$0x1]  ;;  %v46_v54 = vld [vmem:[#allocation2 + $0x1] sm:$0x1] }
   0x9   :  { %v32_v28 = vadd.f32 %v31_v17, %v30_v23  ;;  %v58_v29 = vadd.f32 %v57_v21, %v56_v24  ;;  %v63_v35 = vsel %vm23_vm1, %v52_v26, 0.0  ;;  %s81_s20 = sshll.u32 %s116_s0, 4  ;;  %s82_s20 = int_to_ptr.vmem [resolvable:$true] %s81_s20 }
   0xa   :  { %v65_v38 = vsel %vm35_vm2, %v53_v31, 0.0  ;;  %s91_s21 = scalar_lea.vmem %s82_s20, 32  ;;  %p96_p1 = scmp.lt.s32.totalorder %s82_s20, %s82_s20 }
   0xb   :  { %v34_v33 = vadd.f32 %v33_v25, %v32_v28  ;;  %v60_v34 = vadd.f32 %v59_v27, %v58_v29  ;;  %p92_p0 = scmp.ne.s32.totalorder %s82_s20, %s91_s21  ;;  %p97_p2 = scmp.lt.s32.totalorder %s91_s21, %s91_s21 }
   0xd   :  { %v37_v36 = vadd.f32 %v36_v30, %v34_v33  ;;  %v62_v37 = vadd.f32 %v61_v32, %v60_v34  ;;  %p98_p3 = por %p97_p2, %p96_p1 }
   0xf   :  { %v38_v39 = vrot.slane %v37_v36, 4  ;;  %v64_v40 = vadd.f32 %v63_v35, %v62_v37  ;;  %p99_p4 = pnand %p98_p3, %p92_p0 }
  0x11   :  { %v39_v41 = vadd.f32 %v38_v39, %v37_v36  ;;  %v66_v42 = vadd.f32 %v65_v38, %v64_v40 }
  0x13   :  { %v40_v43 = vrot.slane %v39_v41, 2  ;;  %v67_v44 = vrot.slane %v66_v42, 4 }
  0x15   :  { %v41_v45 = vadd.f32 %v40_v43, %v39_v41  ;;  %v68_v46 = vadd.f32 %v67_v44, %v66_v42 }
  0x17   :  { %v42_v47 = vrot.slane %v41_v45, 1  ;;  %v69_v48 = vrot.slane %v68_v46, 2 }
  0x19   :  { %v43_v50 = vadd.f32 %v42_v47, %v41_v45  ;;  %v70_v51 = vadd.f32 %v69_v48, %v68_v46 }
  0x1b   :  { %v44_v52 = vadd.f32 %v43_v50, %v22_v49  ;;  %v71_v53 = vrot.slane %v70_v51, 1 }
  0x1d   :  { %45 = vst.msk [vmem:[#allocation2] sm:$0x1] %vm35_vm2, %v44_v52  ;;  %v72_v55 = vadd.f32 %v71_v53, %v70_v51 }
  0x1f   :  { %v73_v56 = vadd.f32 %v72_v55, %v46_v54 }
  0x21   :  { %74 = vst.msk [vmem:[#allocation2 + $0x1] sm:$0x1] %vm35_vm2, %v73_v56 }
  0x22   :  { %102 = shalt.err (!%p99_p4)
}
  0x23   :  { %s103_s24 = scalar_lea.hbm %s177_s1, 32 }
  0x24   :  { %p104_p5 = scmp.ne.s32.totalorder %s177_s1, %s103_s24  ;;  %p107_p6 = scmp.lt.u32.totalorder %s103_s24, %s177_s1 }
  0x26   :  { %p109_p7 = pnand %p107_p6, %p104_p5 }
  0x28   :  { %112 = shalt.err (!%p109_p7)
}
  0x29   :  { %84 = dma.vmem_to_hbm [thread:$0]  %s82_s20, 32, %s177_s1, [#allocation3]  }
  0x2a   :  { %113 = dma.done.wait [#allocation3], 32  }
  0x2b   :  { %114 = vsyncadd [#allocation3], 4294967264 }
  0x2c   :  { %88 = vsyncpa [#allocation3], 1 }

</bundles_post_ra>
